<compile_context>
chip_gen: v7x
topology: tpu7x:2x2x1
jax: 0.10.0
libtpu: 0.0.40
codegen_flags: <defaults>
</compile_context>

<pallas_src>
import functools

import jax
import jax.numpy as jnp
from jax.experimental import pallas as pl
from jax.experimental.pallas import tpu as pltpu


# ----------------------------------------------------------------------------
# Stage 1: adaLN modulation  (tiny one-shot kernel; whole arrays in VMEM)
# ----------------------------------------------------------------------------
def _adaln_kernel(c_ref, w_shift_ref, w_scale_ref, b_shift_ref, b_scale_ref,
                  shift_ref, scale_ref):
    """shift/scale = SiLU(c) @ W_{shift,scale} + b_{shift,scale}.

    c_ref:       (B, Dc)
    w_shift_ref: (Dc, H)   (adaLN weight, shift half, in x out)
    w_scale_ref: (Dc, H)
    b_shift_ref: (1, H)
    b_scale_ref: (1, H)
    shift_ref:   (B, H)    f32 output
    scale_ref:   (B, H)    f32 output
    """
    c = c_ref[...].astype(jnp.float32)
    silu_c = c * jax.nn.sigmoid(c)                 # EUP sigmoid + VPU mul
    silu_mxu = silu_c.astype(w_shift_ref.dtype)
    shift = jnp.dot(silu_mxu, w_shift_ref[...],
                    preferred_element_type=jnp.float32)
    shift = shift + b_shift_ref[...].astype(jnp.float32)
    scale = jnp.dot(silu_mxu, w_scale_ref[...],
                    preferred_element_type=jnp.float32)
    scale = scale + b_scale_ref[...].astype(jnp.float32)
    shift_ref[...] = shift.astype(shift_ref.dtype)
    scale_ref[...] = scale.astype(scale_ref.dtype)


# ----------------------------------------------------------------------------
# Stage 2: fused LayerNorm + modulate + final Linear (grid = (B, T//tb))
# ----------------------------------------------------------------------------
def _final_layer_kernel(x_ref, shift_ref, scale_ref, w_lin_ref, b_lin_ref,
                        out_ref, *, eps):
    """One (batch, seq-tile) block.

    x_ref:     (tb, H)      activations
    shift_ref: (1, H)       precomputed adaLN shift (f32)
    scale_ref: (1, H)       precomputed adaLN scale (f32)
    w_lin_ref: (H, O_pad)   final projection weight (in x out), lane-padded
    b_lin_ref: (1, O_pad)   final projection bias, lane-padded
    out_ref:   (tb, O_pad)
    """
    x = x_ref[...].astype(jnp.float32)                         # (tb, H)
    h_inv = 1.0 / x.shape[-1]

    # LayerNorm(elementwise_affine=False, eps): one pass over x for both stats.
    mean = jnp.sum(x, axis=-1, keepdims=True) * h_inv           # (tb, 1)
    mean_sq = jnp.sum(x * x, axis=-1, keepdims=True) * h_inv    # (tb, 1)
    var = mean_sq - mean * mean                                 # biased, as torch
    inv_std = jax.lax.rsqrt(var + eps)

    shift = shift_ref[...].astype(jnp.float32)                  # (1, H)
    scale = scale_ref[...].astype(jnp.float32)                  # (1, H)

    # modulate(x_norm, shift, scale) = x_norm * (1 + scale) + shift
    mod = (x - mean) * inv_std * (1.0 + scale) + shift           # (tb, H)

    # final Linear (MXU, f32 accumulation; operands in weight dtype)
    out = jnp.dot(mod.astype(w_lin_ref.dtype), w_lin_ref[...],
                  preferred_element_type=jnp.float32)            # (tb, O_pad)
    out = out + b_lin_ref[...].astype(jnp.float32)
    out_ref[...] = out.astype(out_ref.dtype)


# ----------------------------------------------------------------------------
# Wrapper
# ----------------------------------------------------------------------------
def _choose_seq_block(T, target=512):
    """Largest tile <= target that divides T and is a multiple of 8; else T."""
    if T <= target:
        return T
    for tb in range(min(target, T), 7, -1):
        if T % tb == 0 and tb % 8 == 0:
            return tb
    return T


def final_layer_forward(x, c, w_ada, b_ada, w_lin, b_lin, *,
                        eps=1e-6, seq_block=None):
    """Mirrors FinalLayer.forward(x, c).

    x:     (B, T, H)
    c:     (B, Dc) with Dc = min(H, 1024)
    w_ada: (Dc, 2H)  -- torch adaLN_modulation[1].weight.T (in x out)
    b_ada: (2H,)
    w_lin: (H, O)    -- torch linear.weight.T (in x out), O = p*p*C
    b_lin: (O,)
    """
    B, T, H = x.shape
    Dc = c.shape[-1]
    O = w_lin.shape[-1]
    assert w_ada.shape == (Dc, 2 * H) and b_ada.shape == (2 * H,)
    assert w_lin.shape == (H, O) and b_lin.shape == (O,)

    # ---- Stage 1: adaLN (shift/scale), computed ONCE per call --------------
    w_shift = w_ada[:, :H]
    w_scale = w_ada[:, H:]
    b_shift = b_ada[:H].reshape(1, H)
    b_scale = b_ada[H:].reshape(1, H)

    vmem_spec = pl.BlockSpec(memory_space=pltpu.MemorySpace.VMEM)
    shift, scale = pl.pallas_call(
        _adaln_kernel,
        out_shape=(jax.ShapeDtypeStruct((B, H), jnp.float32),
                   jax.ShapeDtypeStruct((B, H), jnp.float32)),
        in_specs=[vmem_spec] * 5,
        out_specs=(vmem_spec, vmem_spec),
    )(c, w_shift, w_scale, b_shift, b_scale)
    shift3 = shift.reshape(B, 1, H)
    scale3 = scale.reshape(B, 1, H)

    # ---- Stage 2: main fused kernel -----------------------------------------
    LANE = 128
    O_pad = ((O + LANE - 1) // LANE) * LANE          # lane-dense output
    if O_pad != O:
        w_lin_p = jnp.pad(w_lin, ((0, 0), (0, O_pad - O)))
        b_lin_p = jnp.pad(b_lin, ((0, O_pad - O),))
    else:
        w_lin_p, b_lin_p = w_lin, b_lin
    b_lin_p = b_lin_p.reshape(1, O_pad)

    tb = _choose_seq_block(T) if seq_block is None else seq_block
    assert T % tb == 0, "seq_block must divide T"
    assert tb % 8 == 0 or tb == T, "seq_block must be a multiple of 8 (or == T)"

    itemsize = jnp.dtype(x.dtype).itemsize
    vmem_est = (2 * tb * H * itemsize                 # x, double-buffered
                + 2 * tb * O_pad * itemsize           # out, double-buffered
                + 2 * 2 * H * 4                       # shift/scale (f32)
                + 2 * (H * O_pad + O_pad) * itemsize)  # resident weights
    vmem_limit = int(min(max(2 * vmem_est + (4 << 20), 16 << 20), 64 << 20))

    kernel = functools.partial(_final_layer_kernel, eps=eps)
    out_pad = pl.pallas_call(
        kernel,
        out_shape=jax.ShapeDtypeStruct((B, T, O_pad), x.dtype),
        grid=(B, T // tb),
        in_specs=[
            pl.BlockSpec((None, tb, H), lambda b, t: (b, t, 0)),     # x
            pl.BlockSpec((None, 1, H), lambda b, t: (b, 0, 0)),      # shift
            pl.BlockSpec((None, 1, H), lambda b, t: (b, 0, 0)),      # scale
            pl.BlockSpec((H, O_pad), lambda b, t: (0, 0)),           # w_lin (resident)
            pl.BlockSpec((1, O_pad), lambda b, t: (0, 0)),           # b_lin (resident)
        ],
        out_specs=pl.BlockSpec((None, tb, O_pad), lambda b, t: (b, t, 0)),
        compiler_params=pltpu.CompilerParams(
            dimension_semantics=("parallel", "parallel"),
            vmem_limit_bytes=vmem_limit),
    )(x, shift3, scale3, w_lin_p, b_lin_p)

    return out_pad[..., :O] if O_pad != O else out_pad


# ----------------------------------------------------------------------------
# Pure-JAX reference (matches the PyTorch FinalLayer forward)
# ----------------------------------------------------------------------------
def _reference_forward(x, c, w_ada, b_ada, w_lin, b_lin, eps=1e-6):
    silu_c = c * jax.nn.sigmoid(c)
    ada = silu_c @ w_ada + b_ada                       # (B, 2H)
    shift, scale = jnp.split(ada, 2, axis=-1)          # (B, H) each
    mean = x.mean(-1, keepdims=True)
    var = jnp.square(x - mean).mean(-1, keepdims=True)
    x_norm = (x - mean) / jnp.sqrt(var + eps)
    mod = x_norm * (1.0 + scale[:, None, :]) + shift[:, None, :]
    return mod @ w_lin + b_lin


if __name__ == "__main__":
    B, T, H = 2, 8, 32
    patch_size, out_channels = 2, 4
    O = patch_size * patch_size * out_channels          # 16
    Dc = min(H, 1024)                                   # 32

    key = jax.random.PRNGKey(0)
    kx, kc, kwa, kba, kwl, kbl = jax.random.split(key, 6)
    x = jax.random.normal(kx, (B, T, H), jnp.float32)
    c = jax.random.normal(kc, (B, Dc), jnp.float32)
    # NOTE: the PyTorch module zero-inits `linear`; random weights here make the
    # forward check non-trivial (forward semantics are init-independent).
    w_ada = 0.02 * jax.random.normal(kwa, (Dc, 2 * H), jnp.float32)
    b_ada = 0.02 * jax.random.normal(kba, (2 * H,), jnp.float32)
    w_lin = 0.02 * jax.random.normal(kwl, (H, O), jnp.float32)
    b_lin = 0.02 * jax.random.normal(kbl, (O,), jnp.float32)

    out = final_layer_forward(x, c, w_ada, b_ada, w_lin, b_lin)
    jax.block_until_ready(out)
    ref = _reference_forward(x, c, w_ada, b_ada, w_lin, b_lin)
    assert out.shape == (B, T, O)
    assert jnp.allclose(out, ref, atol=1e-5, rtol=1e-5), "FinalLayer forward mismatch"

    # Faithful-to-spec zero-init check: zero linear weight/bias => zero output.
    out_zero = final_layer_forward(
        x, c, w_ada, b_ada, jnp.zeros_like(w_lin), jnp.zeros_like(b_lin))
    jax.block_until_ready(out_zero)
    assert jnp.allclose(out_zero, jnp.zeros_like(out_zero), atol=1e-6)

    print("KERNEL_OK")
</pallas_src>

<mosaic_0001>
module attributes {stable_mosaic.version = 11 : i64} {
  func.func @_adaln_kernel(%arg0: memref<2x32xf32, #tpu.memory_space<vmem>>, %arg1: memref<32x32xf32, #tpu.memory_space<vmem>>, %arg2: memref<32x32xf32, #tpu.memory_space<vmem>>, %arg3: memref<1x32xf32, #tpu.memory_space<vmem>>, %arg4: memref<1x32xf32, #tpu.memory_space<vmem>>, %arg5: memref<2x32xf32, #tpu.memory_space<vmem>>, %arg6: memref<2x32xf32, #tpu.memory_space<vmem>>) attributes {dimension_semantics = [], scalar_prefetch = 0 : i64, scratch_operands = 0 : i64, tpu.core_type = #tpu.core_type<tc>} {
    %c0 = arith.constant 0 : index
    %c0_0 = arith.constant 0 : index
    %0 = vector.load %arg0[%c0, %c0_0] : memref<2x32xf32, #tpu.memory_space<vmem>>, vector<2x32xf32>
    %1 = arith.negf %0 : vector<2x32xf32>
    %2 = math.exp %1 : vector<2x32xf32>
    %cst = arith.constant 1.000000e+00 : f32
    %3 = vector.broadcast %cst : f32 to vector<2x32xf32>
    %4 = arith.addf %3, %2 : vector<2x32xf32>
    %5 = arith.divf %3, %4 : vector<2x32xf32>
    %6 = arith.mulf %0, %5 : vector<2x32xf32>
    %c0_1 = arith.constant 0 : index
    %c0_2 = arith.constant 0 : index
    %7 = vector.load %arg1[%c0_1, %c0_2] : memref<32x32xf32, #tpu.memory_space<vmem>>, vector<32x32xf32>
    %cst_3 = arith.constant dense<0.000000e+00> : vector<2x32xf32>
    %8 = tpu.matmul %6, %7, %cst_3 {dimension_numbers = #tpu.dot_dimension_numbers<[1], [0], [0], [1], [0, 0, 1, 1], [], []>} : vector<2x32xf32>, vector<32x32xf32>, vector<2x32xf32> -> vector<2x32xf32>
    %c0_4 = arith.constant 0 : index
    %c0_5 = arith.constant 0 : index
    %9 = vector.load %arg3[%c0_4, %c0_5] : memref<1x32xf32, #tpu.memory_space<vmem>>, vector<1x32xf32>
    %10 = vector.broadcast %9 : vector<1x32xf32> to vector<2x32xf32>
    %11 = arith.addf %8, %10 : vector<2x32xf32>
    %c0_6 = arith.constant 0 : index
    %c0_7 = arith.constant 0 : index
    %12 = vector.load %arg2[%c0_6, %c0_7] : memref<32x32xf32, #tpu.memory_space<vmem>>, vector<32x32xf32>
    %cst_8 = arith.constant dense<0.000000e+00> : vector<2x32xf32>
    %13 = tpu.matmul %6, %12, %cst_8 {dimension_numbers = #tpu.dot_dimension_numbers<[1], [0], [0], [1], [0, 0, 1, 1], [], []>} : vector<2x32xf32>, vector<32x32xf32>, vector<2x32xf32> -> vector<2x32xf32>
    %c0_9 = arith.constant 0 : index
    %c0_10 = arith.constant 0 : index
    %14 = vector.load %arg4[%c0_9, %c0_10] : memref<1x32xf32, #tpu.memory_space<vmem>>, vector<1x32xf32>
    %15 = vector.broadcast %14 : vector<1x32xf32> to vector<2x32xf32>
    %16 = arith.addf %13, %15 : vector<2x32xf32>
    %c0_11 = arith.constant 0 : index
    %c0_12 = arith.constant 0 : index
    %17 = vector.load %arg5[%c0_11, %c0_12] : memref<2x32xf32, #tpu.memory_space<vmem>>, vector<2x32xf32>
    tpu.vector_store %arg5[%c0_11, %c0_12], %11 {strides = array<i32>} : memref<2x32xf32, #tpu.memory_space<vmem>>, vector<2x32xf32>,
    %c0_13 = arith.constant 0 : index
    %c0_14 = arith.constant 0 : index
    %18 = vector.load %arg6[%c0_13, %c0_14] : memref<2x32xf32, #tpu.memory_space<vmem>>, vector<2x32xf32>
    tpu.vector_store %arg6[%c0_13, %c0_14], %16 {strides = array<i32>} : memref<2x32xf32, #tpu.memory_space<vmem>>, vector<2x32xf32>,
    return
  }
}

</mosaic_0001>

<bundles_post_ra>
// kernel: tpu_custom_call.1
= control target key start
LH: loop header
LB: loop body
LE: loop exit
PB: predicated region body
PF: predicated region fallthrough
CT: control target
= control target key end

     0   :  { %12 = vsyncpa [#allocation3], 0  ;;  %s568_s0 = inlined_call_operand.hbm [shape: f32[2,32], index: 0, kind: input, shape index: {}]   ;;  %s569_s1 = inlined_call_operand.hbm [shape: f32[32,32], index: 1, kind: input, shape index: {}]   ;;  %s570_s2 = inlined_call_operand.hbm [shape: f32[32,32], index: 2, kind: input, shape index: {}]   ;;  %s571_s3 = inlined_call_operand.vmem [shape: f32[1,32], index: 3, kind: input, shape index: {}]   ;;  %s572_s4 = inlined_call_operand.vmem [shape: f32[1,32], index: 4, kind: input, shape index: {}]   ;;  %s573_s5 = inlined_call_operand.hbm [shape: f32[2,32], index: 5, kind: output, shape index: {0}]   ;;  %s574_s6 = inlined_call_operand.hbm [shape: f32[2,32], index: 6, kind: output, shape index: {1}]  }
   0x1   :  { %13 = vsyncpa [#allocation6], 0 }
   0x2   :  { %14 = vsyncpa [#allocation4], 0 }
   0x3   :  { %15 = vsyncpa [#allocation10], 0  ;;  %s451_s21 = smov [#allocation5]   ;;  %s333_s25 = scalar_lea.hbm %s569_s1, 512 }
   0x4   :  { %s31_s22 = sshll.u32 %s451_s21, 4  ;;  %p334_p0 = scmp.ne.s32.totalorder %s569_s1, %s333_s25  ;;  %s32_s22 = int_to_ptr.vmem [resolvable:$true] %s31_s22 }
   0x5   :  { %p337_p1 = scmp.lt.u32.totalorder %s333_s25, %s569_s1 }
   0x7   :  { %p339_p2 = pnand %p337_p1, %p334_p0 }
   0x9   :  { %342 = shalt.err (!%p339_p2)
}
   0xa   :  { %s343_s30 = scalar_lea.vmem %s32_s22, 512  ;;  %p348_p4 = scmp.lt.s32.totalorder %s32_s22, %s32_s22 }
   0xb   :  { %p344_p3 = scmp.ne.s32.totalorder %s32_s22, %s343_s30  ;;  %p349_p5 = scmp.lt.s32.totalorder %s343_s30, %s343_s30 }
   0xd   :  { %p350_p6 = por %p349_p5, %p348_p4 }
   0xf   :  { %p351_p7 = pnand %p350_p6, %p344_p3 }
  0x11   :  { %354 = shalt.err (!%p351_p7)
}
  0x12   :  { %s452_s7 = smov 128   ;;  %s453_s8 = smov 8  }
  0x13   :  { %37 = dma.hbm_to_vmem [thread:$0]  %s569_s1, 512, %s32_s22, [#allocation6], %s452_s7, %s452_s7, %s453_s8  }
  0x14   :  { %s454_s11 = smov [#allocation2]   ;;  %s455_s13 = smov [#allocation7]  }
  0x15   :  { %s22_s12 = sshll.u32 %s454_s11, 4  ;;  %s43_s14 = sshll.u32 %s455_s13, 4  ;;  %s23_s12 = int_to_ptr.vmem [resolvable:$true] %s22_s12  ;;  %s44_s14 = int_to_ptr.vmem [resolvable:$true] %s43_s14 }
  0x16   :  { %s355_s17 = scalar_lea.hbm %s568_s0, 32 }
  0x17   :  { %p356_p8 = scmp.ne.s32.totalorder %s568_s0, %s355_s17  ;;  %p359_p9 = scmp.lt.u32.totalorder %s355_s17, %s568_s0 }
  0x19   :  { %p361_p10 = pnand %p359_p9, %p356_p8 }
  0x1b   :  { %364 = shalt.err (!%p361_p10)
}
  0x1c   :  { %s365_s1 = scalar_lea.vmem %s23_s12, 32  ;;  %p370_p12 = scmp.lt.s32.totalorder %s23_s12, %s23_s12 }
  0x1d   :  { %p366_p11 = scmp.ne.s32.totalorder %s23_s12, %s365_s1  ;;  %p371_p13 = scmp.lt.s32.totalorder %s365_s1, %s365_s1 }
  0x1f   :  { %p372_p0 = por %p371_p13, %p370_p12 }
  0x21   :  { %p373_p1 = pnand %p372_p0, %p366_p11 }
  0x23   :  { %376 = shalt.err (!%p373_p1)
}
  0x24   :  { %25 = dma.hbm_to_vmem [thread:$0]  %s568_s0, 32, %s23_s12, [#allocation3]  }
  0x25   :  { %s377_s26 = scalar_lea.hbm %s570_s2, 512 }
  0x26   :  { %p378_p2 = scmp.ne.s32.totalorder %s570_s2, %s377_s26  ;;  %p381_p3 = scmp.lt.u32.totalorder %s377_s26, %s570_s2 }
  0x28   :  { %p383_p4 = pnand %p381_p3, %p378_p2 }
  0x2a   :  { %386 = shalt.err (!%p383_p4)
}
  0x2b   :  { %s387_s9 = scalar_lea.vmem %s44_s14, 512  ;;  %p392_p6 = scmp.lt.s32.totalorder %s44_s14, %s44_s14 }
  0x2c   :  { %p388_p5 = scmp.ne.s32.totalorder %s44_s14, %s387_s9  ;;  %p393_p7 = scmp.lt.s32.totalorder %s387_s9, %s387_s9 }
  0x2e   :  { %p394_p8 = por %p393_p7, %p392_p6 }
  0x30   :  { %p395_p9 = pnand %p394_p8, %p388_p5 }
  0x32   :  { %398 = shalt.err (!%p395_p9)
}
  0x33   :  { %49 = dma.hbm_to_vmem [thread:$0]  %s570_s2, 512, %s44_s14, [#allocation6], %s452_s7, %s452_s7, %s453_s8  }
  0x34   :  { %443 = dma.done.wait [#allocation3], 32  }
  0x35   :  { %444 = vsyncadd [#allocation3], 4294967264 }
  0x36   :  { %445 = dma.done.wait [#allocation6], 1024  }
  0x37   :  { %446 = vsyncadd [#allocation6], 4294966272  ;;  %v456_v0 = vmov 0.0|0.0   ;;  %vm457_vm0 = vmmov 0   ;;  %v458_v1 = vmov 0.0   ;;  %v71_v2 = vld [vmem:[#allocation5] sm:$0xff] }
  0x38   :  { %307 = vmatprep.subr.bf16.mxu0 %v456_v0  ;;  %313 = vmatprep.subr.bf16.mxu1 %v456_v0  ;;  %v72_v3 = vld [vmem:[#allocation5 + $0x8] sm:$0xff]  ;;  %v156_v4 = vld [vmem:[#allocation7] sm:$0xff]  ;;  %v73_v7 = vld [vmem:[#allocation5 + $0x10] sm:$0xff]  ;;  %vm82_vm1 = vcmask 261120   ;;  %s459_s12 = smov [#allocation8]   ;;  %s460_s14 = smov [#allocation9]  }
  0x39   :  { %293 = vmatprep.mubr.msk.f32.mxu0 %vm457_vm0, %v458_v1  ;;  %304 = vmatprep.mubr.msk.f32.mxu1 %vm457_vm0, %v458_v1  ;;  %v308_v5 = vpack.c.bf16 %v72_v3, %v71_v2  ;;  %v157_v6 = vld [vmem:[#allocation7 + $0x8] sm:$0xff]  ;;  %v74_v8 = vld [vmem:[#allocation5 + $0x18] sm:$0xff]  ;;  %v158_v10 = vld [vmem:[#allocation7 + $0x10] sm:$0xff]  ;;  %s246_s13 = sshll.u32 %s459_s12, 4  ;;  %s256_s15 = sshll.u32 %s460_s14, 4  ;;  %vm237_vm2 = vcmask 254976   ;;  %s247_s13 = int_to_ptr.vmem [resolvable:$true] %s246_s13  ;;  %s257_s15 = int_to_ptr.vmem [resolvable:$true] %s256_s15 }
  0x3a   :  { %v314_v9 = vpack.c.bf16 %v157_v6, %v156_v4  ;;  %v159_v11 = vld [vmem:[#allocation7 + $0x18] sm:$0xff]  ;;  %v311_v13 = vpack.c.bf16 %v74_v8, %v73_v7  ;;  %p404_p11 = scmp.lt.s32.totalorder %s247_s13, %s247_s13 }
  0x3b   :  { %v63_v12 = vld [vmem:[#allocation2] sm:$0x3]  ;;  %309 = vmatpush3.bf16.msra.mxu0 %v308_v5  ;;  %v317_v15 = vpack.c.bf16 %v159_v11, %v158_v10 }
  0x3c   :  { %v270_v14 = vmul.f32 -1.442695, %v63_v12  ;;  %315 = vmatpush3.bf16.msra.mxu1 %v314_v9  ;;  %310 = vmatprep.subr.bf16.mxu0 %v456_v0  ;;  %v271_v20 = vld [vmem:[%s571_s3] ss:$0 sm:$0xff]  ;;  %s399_s3 = scalar_lea.vmem %s247_s13, 32 }
  0x3d   :  { %316 = vmatprep.subr.bf16.mxu1 %v456_v0  ;;  %v273_v21 = vld [vmem:[%s572_s4] ss:$0 sm:$0xff]  ;;  %p400_p10 = scmp.ne.s32.totalorder %s247_s13, %s399_s3  ;;  %p405_p12 = scmp.lt.s32.totalorder %s399_s3, %s399_s3 }
  0x3e   :  { %329 = vpow2.f32 %v270_v14 }
  0x3f   :  { %312 = vmatpush3.bf16.msra.mxu0 %v311_v13  ;;  %p406_p13 = por %p405_p12, %p404_p11 }
  0x40   :  { %318 = vmatpush3.bf16.msra.mxu1 %v317_v15 }
  0x41   :  { %p407_p0 = pnand %p406_p13, %p400_p10 }
  0x48   :  { %v330_v16 = vpop.eup %329 }
  0x49   :  { %v67_v17 = vadd.f32 1.0, %v330_v16 }
  0x4b   :  { %331 = vrcp.f32 %v67_v17 }
  0x55   :  { %v332_v18 = vpop.eup %331 }
  0x56   :  { %v70_v19 = vmul.f32 %v332_v18, %v63_v12 }
  0x58   :  { %294 = vmatmul.mubr.msk.f32.vlgmr.msra.gmra.mrb[0].mxu0 %vm82_vm1, %v70_v19  ;;  %305 = vmatmul.mubr.msk.f32.vlgmr.msra.gmra.mrb[0].mxu1 %vm82_vm1, %v70_v19 }
 0x12b   :  { %v152_v22 = vpop.f32.mrb[0].mxu0  ;;  %v233_v23 = vpop.f32.mrb[0].mxu1 }
 0x12c   :  { %v153_v24 = vadd.f32 %v271_v20, %v152_v22  ;;  %v234_v25 = vadd.f32 %v273_v21, %v233_v23  ;;  %v295_v26 = vpop.f32.mrb[1].mxu0  ;;  %v306_v27 = vpop.f32.mrb[1].mxu1 }
 0x12e   :  { %238 = vst.msk [vmem:[#allocation8] sm:$0x3] %vm237_vm2, %v153_v24  ;;  %239 = vst.msk [vmem:[#allocation9] sm:$0x3] %vm237_vm2, %v234_v25 }
 0x12f   :  { %410 = shalt.err (!%p407_p0)
}
 0x130   :  { %s411_s17 = scalar_lea.hbm %s573_s5, 32 }
 0x131   :  { %p412_p1 = scmp.ne.s32.totalorder %s573_s5, %s411_s17  ;;  %p415_p2 = scmp.lt.u32.totalorder %s411_s17, %s573_s5 }
 0x133   :  { %p417_p3 = pnand %p415_p2, %p412_p1 }
 0x135   :  { %420 = shalt.err (!%p417_p3)
}
 0x136   :  { %249 = dma.vmem_to_hbm [thread:$0]  %s247_s13, 32, %s573_s5, [#allocation4]  }
 0x137   :  { %s421_s23 = scalar_lea.vmem %s257_s15, 32  ;;  %p426_p5 = scmp.lt.s32.totalorder %s257_s15, %s257_s15 }
 0x138   :  { %p422_p4 = scmp.ne.s32.totalorder %s257_s15, %s421_s23  ;;  %p427_p6 = scmp.lt.s32.totalorder %s421_s23, %s421_s23 }
 0x13a   :  { %p428_p7 = por %p427_p6, %p426_p5 }
 0x13c   :  { %p429_p8 = pnand %p428_p7, %p422_p4 }
 0x13e   :  { %432 = shalt.err (!%p429_p8)
}
 0x13f   :  { %s433_s26 = scalar_lea.hbm %s574_s6, 32 }
 0x140   :  { %p434_p9 = scmp.ne.s32.totalorder %s574_s6, %s433_s26  ;;  %p437_p10 = scmp.lt.u32.totalorder %s433_s26, %s574_s6 }
 0x142   :  { %p439_p11 = pnand %p437_p10, %p434_p9 }
 0x144   :  { %442 = shalt.err (!%p439_p11)
}
 0x145   :  { %259 = dma.vmem_to_hbm [thread:$0]  %s257_s15, 32, %s574_s6, [#allocation10]  }
 0x146   :  { %447 = dma.done.wait [#allocation4], 32  }
 0x147   :  { %448 = vsyncadd [#allocation4], 4294967264 }
 0x148   :  { %449 = dma.done.wait [#allocation10], 32  }
 0x149   :  { %450 = vsyncadd [#allocation10], 4294967264 }
 0x14a   :  { %266 = vsyncpa [#allocation3], 1 }
 0x14b   :  { %267 = vsyncpa [#allocation6], 1 }
 0x14c   :  { %268 = vsyncpa [#allocation4], 1 }
 0x14d   :  { %269 = vsyncpa [#allocation10], 1 }

</bundles_post_ra>
